<compile_context>
chip_gen: v5e
topology: v5e:2x2
jax: 0.10.0
libtpu: 0.0.40
codegen_flags: <defaults>
</compile_context>

<pallas_src>
import jax
import jax.numpy as jnp
from jax.experimental import pallas as pl
from jax.experimental.pallas import tpu as pltpu


# -----------------------------------------------------------------------------
# Pallas kernel: per (b, s_tile) grid step run the MLP for Sb centroids x K
# neighbours at once, then max-pool over K inside the kernel.
# -----------------------------------------------------------------------------
def _make_msg_kernel(num_layers, sb, K):
    def kernel(*refs):
        x_ref = refs[0]                     # (1, Sb*K, Cin)  bf16
        out_ref = refs[-1]                  # (1, Cout, Sb)   f32
        params = refs[1:-1]                 # (w0, scale0, shift0, w1, ...)

        h = x_ref[0]                        # (Sb*K, Cin) bf16
        for j in range(num_layers):
            w = params[3 * j][...]          # (Cprev, Cout) bf16
            sc = params[3 * j + 1][...]     # (1, Cout) f32  folded BN scale
            sh = params[3 * j + 2][...]     # (1, Cout) f32  folded conv-bias + BN shift
            acc = jnp.dot(h, w, preferred_element_type=jnp.float32)   # MXU, f32 acc
            acc = jnp.maximum(acc * sc + sh, 0.0)                     # BN(eval) + ReLU in f32
            h = acc.astype(jnp.bfloat16) if j + 1 < num_layers else acc

        cout = h.shape[-1]
        pooled = jnp.max(h.reshape(sb, K, cout), axis=1)   # max over neighbours -> (Sb, Cout)
        out_ref[0] = pooled.T.astype(out_ref.dtype)        # (Cout, Sb): lane-dense over S

    return kernel


def _choose_sb(S, K, Cin, itemsize=2, budget_bytes=24 << 20):
    """Largest S-tile whose double-buffered input block fits a conservative VMEM budget.
    Prefers full S; otherwise multiples of 128 that divide S (keeps output lane-dense)."""
    if 2 * S * K * Cin * itemsize <= budget_bytes or S % 128 != 0:
        return S
    sb = 128
    for cand in range(128, S, 128):
        if S % cand == 0 and 2 * cand * K * Cin * itemsize <= budget_bytes:
            sb = cand
    return sb


def msg_mlp_max(grouped, weights, scales, shifts):
    """grouped: [B, S, K, Cin] -> [B, Cout_last, S] (MLP over Cin, then max over K)."""
    B, S, K, Cin = grouped.shape
    num_layers = len(weights)
    c_out = weights[-1].shape[1]

    # bf16 at the boundary: halves grouped-tensor DMA bytes, bf16 MXU on all gens.
    grouped = grouped.astype(jnp.bfloat16).reshape(B, S * K, Cin)   # free reshape
    weights = [w.astype(jnp.bfloat16) for w in weights]

    sb = _choose_sb(S, K, Cin)
    n_s = S // sb

    in_specs = [pl.BlockSpec((1, sb * K, Cin), lambda b, s: (b, s, 0))]
    args = [grouped]
    # TODO(synk): weight/scale/shift blocks are constant across the grid; they could be
    # single-buffered (pipeline_mode) to free a little VMEM on v7x.
    for w, scl, shf in zip(weights, scales, shifts):
        in_specs.append(pl.BlockSpec(w.shape, lambda b, s: (0, 0)))
        in_specs.append(pl.BlockSpec(scl.shape, lambda b, s: (0, 0)))
        in_specs.append(pl.BlockSpec(shf.shape, lambda b, s: (0, 0)))
        args.extend([w, scl, shf])

    return pl.pallas_call(
        _make_msg_kernel(num_layers, sb, K),
        grid=(B, n_s),
        in_specs=in_specs,
        out_specs=pl.BlockSpec((1, c_out, sb), lambda b, s: (b, 0, s)),
        out_shape=jax.ShapeDtypeStruct((B, c_out, S), jnp.float32),
        compiler_params=pltpu.CompilerParams(
            dimension_semantics=("parallel", "parallel"),
            vmem_limit_bytes=48 * 1024 * 1024),
    )(*args)


# -----------------------------------------------------------------------------
# Plain-JAX glue: FPS, ball query, gathers (index_points), parameter folding.
# -----------------------------------------------------------------------------
def farthest_point_sample(xyz, npoint):
    # xyz: [B, N, 3].  Deterministic: initial farthest point is index 0
    # (PyTorch uses torch.randint for the seed point).
    B, N, _ = xyz.shape

    def body(i, state):
        centroids, distance, farthest = state
        centroids = centroids.at[:, i].set(farthest)
        centroid = jnp.take_along_axis(xyz, farthest[:, None, None], axis=1)  # [B,1,3]
        dist = jnp.sum((xyz - centroid) ** 2, axis=-1)                        # [B,N]
        distance = jnp.minimum(distance, dist)
        farthest = jnp.argmax(distance, axis=-1).astype(jnp.int32)
        return centroids, distance, farthest

    centroids = jnp.zeros((B, npoint), dtype=jnp.int32)
    distance = jnp.full((B, N), 1e10, dtype=jnp.float32)
    farthest = jnp.zeros((B,), dtype=jnp.int32)
    centroids, _, _ = jax.lax.fori_loop(0, npoint, body, (centroids, distance, farthest))
    return centroids


def index_points(points, idx):
    # points: [B, N, C], idx: [B, ...] -> [B, ..., C]
    return jax.vmap(lambda p, i: p[i])(points, idx)


def square_distance(src, dst):
    # src: [B, N, C], dst: [B, M, C] -> [B, N, M]
    dist = -2.0 * jnp.matmul(src, jnp.transpose(dst, (0, 2, 1)))
    dist = dist + jnp.sum(src ** 2, axis=-1)[..., None]
    dist = dist + jnp.sum(dst ** 2, axis=-1)[:, None, :]
    return dist


def query_ball_point(radius, nsample, xyz, new_xyz):
    B, N, _ = xyz.shape
    S = new_xyz.shape[1]
    group_idx = jnp.broadcast_to(jnp.arange(N, dtype=jnp.int32)[None, None, :], (B, S, N))
    sqrdists = square_distance(new_xyz, xyz)
    group_idx = jnp.where(sqrdists > radius ** 2, N, group_idx)
    group_idx = jnp.sort(group_idx, axis=-1)[:, :, :nsample]
    group_first = group_idx[:, :, 0:1]
    group_idx = jnp.where(group_idx == N, group_first, group_idx)
    return group_idx


def init_params(key, in_channel, mlp_list):
    """Deterministic synthetic parameters.  BN is folded as eval-mode affine:
    scale = gamma / sqrt(running_var + eps); shift = (conv_bias - running_mean)*scale + beta.
    """
    # TODO(synk): training-mode BatchNorm2d (batch statistics over B*K*S) is not
    # reproduced; eval-mode running stats are folded into scale/shift instead.
    eps = 1e-5
    params = []
    for mlp in mlp_list:
        last_c = in_channel + 3
        ws, scs, shs = [], [], []
        for out_c in mlp:
            key, k1, k2, k3, k4 = jax.random.split(key, 5)
            w = 0.1 * jax.random.normal(k1, (last_c, out_c), jnp.float32)   # conv W^T
            b = 0.1 * jax.random.normal(k2, (out_c,), jnp.float32)          # conv bias
            gamma = 1.0 + 0.1 * jax.random.normal(k3, (out_c,), jnp.float32)
            beta = 0.1 * jax.random.normal(k4, (out_c,), jnp.float32)
            running_mean = jnp.zeros((out_c,), jnp.float32)
            running_var = jnp.ones((out_c,), jnp.float32)
            scale = gamma / jnp.sqrt(running_var + eps)
            shift = (b - running_mean) * scale + beta
            ws.append(w)
            scs.append(scale[None, :])
            shs.append(shift[None, :])
            last_c = out_c
        params.append({"w": ws, "scale": scs, "shift": shs})
    return params


def pointnet_sa_msg_forward(xyz_bcn, points_bdn, params,
                            npoint, radius_list, nsample_list):
    """Matches PointNetSetAbstractionMsg.forward.
    xyz_bcn: [B, 3, N], points_bdn: [B, D, N]
    returns new_xyz: [B, 3, npoint], new_points_concat: [B, sum(last mlp), npoint]
    """
    xyz = jnp.transpose(xyz_bcn, (0, 2, 1))            # [B, N, 3]
    points = jnp.transpose(points_bdn, (0, 2, 1))      # [B, N, D]
    B, N, C = xyz.shape
    S = npoint

    fps_idx = farthest_point_sample(xyz, S)            # [B, S]
    new_xyz = index_points(xyz, fps_idx)               # [B, S, 3]

    new_points_list = []
    for i, radius in enumerate(radius_list):
        K = nsample_list[i]
        group_idx = query_ball_point(radius, K, xyz, new_xyz)     # [B, S, K]
        grouped_xyz = index_points(xyz, group_idx)                # [B, S, K, 3]
        grouped_xyz = grouped_xyz - new_xyz[:, :, None, :]
        grouped_points = index_points(points, group_idx)          # [B, S, K, D]
        grouped = jnp.concatenate([grouped_points, grouped_xyz], axis=-1)  # [B,S,K,D+3]
        # No transpose: kernel consumes the grouping layout directly and emits [B, Cout, S].
        out = msg_mlp_max(grouped,
                          params[i]["w"], params[i]["scale"], params[i]["shift"])
        new_points_list.append(out)                               # [B, Cout, S]

    new_xyz_out = jnp.transpose(new_xyz, (0, 2, 1))               # [B, 3, S]
    new_points_concat = jnp.concatenate(new_points_list, axis=1)  # [B, sum(Cout), S]
    return new_xyz_out, new_points_concat


if __name__ == "__main__":
    # Small, forward-consistent shapes.
    B, N, D = 2, 32, 4                  # batch, points, extra feature channels
    npoint = 8
    radius_list = [0.2, 0.4]
    nsample_list = [8, 16]
    mlp_list = [[16, 32], [16, 32, 64]]
    in_channel = D

    key = jax.random.PRNGKey(0)
    key, kx, kp, kparam = jax.random.split(key, 4)
    xyz = jax.random.uniform(kx, (B, 3, N), jnp.float32)          # [B, 3, N]
    points = jax.random.normal(kp, (B, D, N), jnp.float32)        # [B, D, N]

    params = init_params(kparam, in_channel, mlp_list)

    new_xyz, new_points = pointnet_sa_msg_forward(
        xyz, points, params, npoint, radius_list, nsample_list)
    jax.block_until_ready((new_xyz, new_points))

    assert new_xyz.shape == (B, 3, npoint)
    assert new_points.shape == (B, sum(m[-1] for m in mlp_list), npoint)
    assert bool(jnp.all(jnp.isfinite(new_points)))
    print("KERNEL_OK")
</pallas_src>

<mosaic_0001>
module attributes {stable_mosaic.version = 11 : i64} {
  func.func @kernel(%arg0: i32, %arg1: i32, %arg2: memref<1x64x7xbf16, #tpu.memory_space<vmem>>, %arg3: memref<7x16xbf16, #tpu.memory_space<vmem>>, %arg4: memref<1x16xf32, #tpu.memory_space<vmem>>, %arg5: memref<1x16xf32, #tpu.memory_space<vmem>>, %arg6: memref<16x32xbf16, #tpu.memory_space<vmem>>, %arg7: memref<1x32xf32, #tpu.memory_space<vmem>>, %arg8: memref<1x32xf32, #tpu.memory_space<vmem>>, %arg9: memref<1x32x8xf32, #tpu.memory_space<vmem>>) attributes {dimension_semantics = [#tpu.dimension_semantics<parallel>, #tpu.dimension_semantics<parallel>], iteration_bounds = array<i64: 2, 1>, scalar_prefetch = 0 : i64, scratch_operands = 0 : i64, tpu.core_type = #tpu.core_type<tc>, window_params = [{transform_indices = @transform_0, window_bounds = array<i64: 1, 64, 7>}, {pipeline_mode = #tpu.pipeline_mode<synchronous>, transform_indices = @transform_1, window_bounds = array<i64: 7, 16>}, {pipeline_mode = #tpu.pipeline_mode<synchronous>, transform_indices = @transform_2, window_bounds = array<i64: 1, 16>}, {pipeline_mode = #tpu.pipeline_mode<synchronous>, transform_indices = @transform_3, window_bounds = array<i64: 1, 16>}, {pipeline_mode = #tpu.pipeline_mode<synchronous>, transform_indices = @transform_4, window_bounds = array<i64: 16, 32>}, {pipeline_mode = #tpu.pipeline_mode<synchronous>, transform_indices = @transform_5, window_bounds = array<i64: 1, 32>}, {pipeline_mode = #tpu.pipeline_mode<synchronous>, transform_indices = @transform_6, window_bounds = array<i64: 1, 32>}, {transform_indices = @transform_7, window_bounds = array<i64: 1, 32, 8>}]} {
    %c0 = arith.constant 0 : index
    %c0_0 = arith.constant 0 : index
    %c0_1 = arith.constant 0 : index
    %0 = vector.load %arg2[%c0, %c0_0, %c0_1] : memref<1x64x7xbf16, #tpu.memory_space<vmem>>, vector<1x64x7xbf16>
    %1 = vector.shape_cast %0 : vector<1x64x7xbf16> to vector<64x7xbf16>
    %c0_2 = arith.constant 0 : index
    %c0_3 = arith.constant 0 : index
    %2 = vector.load %arg3[%c0_2, %c0_3] : memref<7x16xbf16, #tpu.memory_space<vmem>>, vector<7x16xbf16>
    %c0_4 = arith.constant 0 : index
    %c0_5 = arith.constant 0 : index
    %3 = vector.load %arg4[%c0_4, %c0_5] : memref<1x16xf32, #tpu.memory_space<vmem>>, vector<1x16xf32>
    %c0_6 = arith.constant 0 : index
    %c0_7 = arith.constant 0 : index
    %4 = vector.load %arg5[%c0_6, %c0_7] : memref<1x16xf32, #tpu.memory_space<vmem>>, vector<1x16xf32>
    %cst = arith.constant dense<0.000000e+00> : vector<64x16xf32>
    %5 = tpu.matmul %1, %2, %cst {dimension_numbers = #tpu.dot_dimension_numbers<[1], [0], [0], [1], [0, 0, 1, 1], [], []>} : vector<64x7xbf16>, vector<7x16xbf16>, vector<64x16xf32> -> vector<64x16xf32>
    %6 = vector.broadcast %3 : vector<1x16xf32> to vector<64x16xf32>
    %7 = arith.mulf %5, %6 : vector<64x16xf32>
    %8 = vector.broadcast %4 : vector<1x16xf32> to vector<64x16xf32>
    %9 = arith.addf %7, %8 : vector<64x16xf32>
    %cst_8 = arith.constant 0.000000e+00 : f32
    %10 = vector.broadcast %cst_8 : f32 to vector<64x16xf32>
    %11 = arith.maximumf %9, %10 : vector<64x16xf32>
    %12 = arith.truncf %11 : vector<64x16xf32> to vector<64x16xbf16>
    %c0_9 = arith.constant 0 : index
    %c0_10 = arith.constant 0 : index
    %13 = vector.load %arg6[%c0_9, %c0_10] : memref<16x32xbf16, #tpu.memory_space<vmem>>, vector<16x32xbf16>
    %c0_11 = arith.constant 0 : index
    %c0_12 = arith.constant 0 : index
    %14 = vector.load %arg7[%c0_11, %c0_12] : memref<1x32xf32, #tpu.memory_space<vmem>>, vector<1x32xf32>
    %c0_13 = arith.constant 0 : index
    %c0_14 = arith.constant 0 : index
    %15 = vector.load %arg8[%c0_13, %c0_14] : memref<1x32xf32, #tpu.memory_space<vmem>>, vector<1x32xf32>
    %cst_15 = arith.constant dense<0.000000e+00> : vector<64x32xf32>
    %16 = tpu.matmul %12, %13, %cst_15 {dimension_numbers = #tpu.dot_dimension_numbers<[1], [0], [0], [1], [0, 0, 1, 1], [], []>} : vector<64x16xbf16>, vector<16x32xbf16>, vector<64x32xf32> -> vector<64x32xf32>
    %17 = vector.broadcast %14 : vector<1x32xf32> to vector<64x32xf32>
    %18 = arith.mulf %16, %17 : vector<64x32xf32>
    %19 = vector.broadcast %15 : vector<1x32xf32> to vector<64x32xf32>
    %20 = arith.addf %18, %19 : vector<64x32xf32>
    %cst_16 = arith.constant 0.000000e+00 : f32
    %21 = vector.broadcast %cst_16 : f32 to vector<64x32xf32>
    %22 = arith.maximumf %20, %21 : vector<64x32xf32>
    %23 = vector.shape_cast %22 : vector<64x32xf32> to vector<8x8x32xf32>
    %cst_17 = arith.constant dense<0xFF800000> : vector<8x32xf32>
    %24 = vector.multi_reduction <maximumf>, %23, %cst_17 [1] : vector<8x8x32xf32> to vector<8x32xf32>
    %25 = tpu.transpose %24, [1, 0] : vector<8x32xf32> -> vector<32x8xf32>
    %c0_18 = arith.constant 0 : index
    %c0_19 = arith.constant 0 : index
    %c0_20 = arith.constant 0 : index
    %26 = vector.load %arg9[%c0_18, %c0_19, %c0_20] : memref<1x32x8xf32, #tpu.memory_space<vmem>>, vector<1x32x8xf32>
    %27 = vector.shape_cast %26 : vector<1x32x8xf32> to vector<32x8xf32>
    %28 = vector.shape_cast %25 : vector<32x8xf32> to vector<1x32x8xf32>
    tpu.vector_store %arg9[%c0_18, %c0_19, %c0_20], %28 {strides = array<i32>} : memref<1x32x8xf32, #tpu.memory_space<vmem>>, vector<1x32x8xf32>,
    return
  }
  func.func @transform_0(%arg0: i32, %arg1: i32) -> (i32, i32, i32) {
    %c0_i32 = arith.constant 0 : i32
    %c0_i32_0 = arith.constant 0 : i32
    return %arg0, %arg1, %c0_i32 : i32, i32, i32
  }
  func.func @transform_1(%arg0: i32, %arg1: i32) -> (i32, i32) {
    %c0_i32 = arith.constant 0 : i32
    %c0_i32_0 = arith.constant 0 : i32
    %c0_i32_1 = arith.constant 0 : i32
    return %c0_i32, %c0_i32_0 : i32, i32
  }
  func.func @transform_2(%arg0: i32, %arg1: i32) -> (i32, i32) {
    %c0_i32 = arith.constant 0 : i32
    %c0_i32_0 = arith.constant 0 : i32
    %c0_i32_1 = arith.constant 0 : i32
    return %c0_i32, %c0_i32_0 : i32, i32
  }
  func.func @transform_3(%arg0: i32, %arg1: i32) -> (i32, i32) {
    %c0_i32 = arith.constant 0 : i32
    %c0_i32_0 = arith.constant 0 : i32
    %c0_i32_1 = arith.constant 0 : i32
    return %c0_i32, %c0_i32_0 : i32, i32
  }
  func.func @transform_4(%arg0: i32, %arg1: i32) -> (i32, i32) {
    %c0_i32 = arith.constant 0 : i32
    %c0_i32_0 = arith.constant 0 : i32
    %c0_i32_1 = arith.constant 0 : i32
    return %c0_i32, %c0_i32_0 : i32, i32
  }
  func.func @transform_5(%arg0: i32, %arg1: i32) -> (i32, i32) {
    %c0_i32 = arith.constant 0 : i32
    %c0_i32_0 = arith.constant 0 : i32
    %c0_i32_1 = arith.constant 0 : i32
    return %c0_i32, %c0_i32_0 : i32, i32
  }
  func.func @transform_6(%arg0: i32, %arg1: i32) -> (i32, i32) {
    %c0_i32 = arith.constant 0 : i32
    %c0_i32_0 = arith.constant 0 : i32
    %c0_i32_1 = arith.constant 0 : i32
    return %c0_i32, %c0_i32_0 : i32, i32
  }
  func.func @transform_7(%arg0: i32, %arg1: i32) -> (i32, i32, i32) {
    %c0_i32 = arith.constant 0 : i32
    %c0_i32_0 = arith.constant 0 : i32
    return %arg0, %c0_i32, %arg1 : i32, i32, i32
  }
}

</mosaic_0001>

<bundles_post_ra>
// kernel: tpu_custom_call.1
= control target key start
LH: loop header
LB: loop body
LE: loop exit
PB: predicated region body
PF: predicated region fallthrough
CT: control target
= control target key end

     0   :  { %s855_s24 = smov 0   ;;  %s857_s25 = smov 0   ;;  %s935_s0 = inlined_call_operand.vmem [shape: bf16[2,64,7], index: 0, kind: input, shape index: {}]   ;;  %s936_s1 = inlined_call_operand.vmem [shape: bf16[7,16], index: 1, kind: input, shape index: {}]   ;;  %s937_s2 = inlined_call_operand.vmem [shape: f32[1,16], index: 2, kind: input, shape index: {}]   ;;  %s938_s3 = inlined_call_operand.vmem [shape: f32[1,16], index: 3, kind: input, shape index: {}]   ;;  %s939_s4 = inlined_call_operand.vmem [shape: bf16[16,32], index: 4, kind: input, shape index: {}]   ;;  %s940_s5 = inlined_call_operand.vmem [shape: f32[1,32], index: 5, kind: input, shape index: {}]   ;;  %s941_s6 = inlined_call_operand.vmem [shape: f32[1,32], index: 6, kind: input, shape index: {}]   ;;  %s942_s7 = inlined_call_operand.vmem [shape: f32[2,32,8], index: 7, kind: output, shape index: {}]  }
   0x1   :  { %s859_s26 = smov 0  }
   0x2 LB: > { %s29_s27 = sadd.s32 1, %s808_s25  ;;  %p716_p0 = scmp.ge.s32.totalorder %s812_s26, 1  ;;  %s812_s26 = sphi %s859_s26, %s17_s26   ;;  %s808_s25 = sphi %s857_s25, %s944_s25   ;;  %s804_s24 = sphi %s855_s24, %s943_s24  }
   0x3   : > { %p31_p1 = scmp.ge.s32.totalorder %s29_s27, 2  ;;  %p258_p2 = scmp.lt.s32.totalorder %s812_s26, 3 }
   0x5   : > { %s946_s27 = smov (%p31_p1, %s29_s27), 0  ;;  %p259_p3 = pnand %p716_p0, %p258_p2 }
   0x6   : > { %p298_p4 = scmp.lt.s32.totalorder (!%p259_p3), %s804_s24, 1 }
   0x7   : > { %262 = sbr.rel (%p259_p3) target bundleno = 534 (0x216), region = 48 }
   0xc   : > { %v324_v0 = vld [vmem:[%s936_s1] sm:$0xf]  ;;  %vm360_vm0 = vcmask 1042432   ;;  %vm361_vm1 = vcmask 1043456   ;;  %v814_v1 = vmov 65535   ;;  %s948_s24 = smov (!%p298_p4, %s804_s24), 1 }
   0xd   : > { %v362_v2 = vsel %vm360_vm0, 4294967295, %v814_v1  ;;  %s751_s30 = sshll.u32 %s948_s24, 5  ;;  %vm347_vm2 = vcmask 56320   ;;  %v757_v9 = vld [vmem:[%s939_s4] sm:$0xff]  ;;  %vm440_vm3 = vcmask 130048   ;;  %vm512_vm4 = vcmask 261120  }
   0xe   : > { %v363_v3 = vsel %vm361_vm1, %v362_v2, 0  ;;  %s305_s10 = scalar_lea.vmem %s935_s0, %s751_s30  ;;  %460 = vmatpush.bf16.msra.mxu1 %v757_v9  ;;  %759 = vmatpush.bf16.msra.mxu3 %v757_v9  ;;  %v786_v11 = vld [vmem:[%s937_s2] ss:$0 sm:$0xff]  ;;  %vm577_vm5 = vcmask 1041409   ;;  %vm579_vm6 = vcmask 1042434   ;;  %vm581_vm7 = vcmask 1043459   ;;  %s314_s23 = scalar_lea.vmem %s942_s7, %s751_s30 }
   0xf   : > { %v365_v4 = vand.u32 %v363_v3, %v324_v0  ;;  %v753_v5 = vld [vmem:[%s305_s10] sm:$0xff]  ;;  %v755_v6 = vld [vmem:[%s305_s10 + $0x10] sm:$0xff]  ;;  %v754_v7 = vld [vmem:[%s305_s10 + $0x8] sm:$0xff]  ;;  %vm583_vm8 = vcmask 1044484   ;;  %vm585_vm9 = vcmask 1045509   ;;  %vm587_vm10 = vcmask 1046534  }
  0x10   : > { %v756_v8 = vld [vmem:[%s305_s10 + $0x18] sm:$0xff]  ;;  %v787_v13 = vld [vmem:[%s938_s3] ss:$0 sm:$0xff]  ;;  %vm589_vm11 = vcmask 1047559   ;;  %vm624_vm12 = vcmask 64512  }
  0x11   : > { %374 = vmatpush.bf16.msra.mxu0 %v365_v4  ;;  %758 = vmatpush.bf16.msra.mxu2 %v365_v4  ;;  %v788_v49 = vld [vmem:[%s940_s5] ss:$0 sm:$0xff] }
  0x12   : > { %v903_v51 = vld [vmem:[%s941_s6] ss:$0 sm:$0xff] }
  0x14   : > { %737 = vmatmul.msk.bf16.vlgmr.msra.gmra.mxu0 %vm347_vm2, %v753_v5  ;;  %739 = vmatmul.msk.bf16.vlgmr.msra.gmra.mxu2 %vm347_vm2, %v755_v6 }
  0x24   : > { %738 = vmatmul.msk.bf16.gmra.mxu0 %vm347_vm2, %v754_v7  ;;  %740 = vmatmul.msk.bf16.gmra.mxu2 %vm347_vm2, %v756_v8 }
  0x91   : > { %v376_v10 = vpop.f32.mrf.mxu0 }
  0x92   : > { %v399_v12 = vmul.f32 %v786_v11, %v376_v10 }
  0x94   : > { %v410_v15 = vadd.f32 %v787_v13, %v399_v12 }
  0x96   : > { %v418_v18 = vmax.f32 %v410_v15, 0.0 }
  0x97   : > { %v386_v14 = vpop.f32.mrf.mxu2 }
  0x98   : > { %v403_v19 = vmul.f32 %v786_v11, %v386_v14 }
  0x99   : > { %v378_v16 = vpop.f32.mrf.mxu0 }
  0x9a   : > { %v400_v17 = vmul.f32 %v786_v11, %v378_v16  ;;  %v414_v23 = vadd.f32 %v787_v13, %v403_v19 }
  0x9c   : > { %v411_v20 = vadd.f32 %v787_v13, %v400_v17  ;;  %v422_v28 = vmax.f32 %v414_v23, 0.0 }
  0x9e   : > { %v419_v21 = vmax.f32 %v411_v20, 0.0 }
  0x9f   : > { %v388_v22 = vpop.f32.mrf.mxu2 }
  0xa0   : > { %v404_v24 = vmul.f32 %v786_v11, %v388_v22  ;;  %v426_v25 = vpack.c.bf16 %v419_v21, %v418_v18 }
  0xa1   : > { %v381_v26 = vpop.f32.mrf.mxu0 }
  0xa2   : > { %v415_v27 = vadd.f32 %v787_v13, %v404_v24  ;;  %745 = vmatmul.msk.bf16.vlgmr.msra.gmra.mxu1 %vm440_vm3, %v426_v25  ;;  %v401_v30 = vmul.f32 %v786_v11, %v381_v26 }
  0xa4   : > { %v423_v29 = vmax.f32 %v415_v27, 0.0  ;;  %v412_v33 = vadd.f32 %v787_v13, %v401_v30 }
  0xa6   : > { %v428_v31 = vpack.c.bf16 %v423_v29, %v422_v28  ;;  %v420_v36 = vmax.f32 %v412_v33, 0.0 }
  0xa7   : > { %v391_v32 = vpop.f32.mrf.mxu2 }
  0xa8   : > { %747 = vmatmul.msk.bf16.vlgmr.msra.gmra.mxu3 %vm440_vm3, %v428_v31  ;;  %v405_v37 = vmul.f32 %v786_v11, %v391_v32 }
  0xa9   : > { %v383_v34 = vpop.f32.mrf.mxu0 }
  0xaa   : > { %v402_v35 = vmul.f32 %v786_v11, %v383_v34  ;;  %v416_v41 = vadd.f32 %v787_v13, %v405_v37 }
  0xac   : > { %v413_v38 = vadd.f32 %v787_v13, %v402_v35  ;;  %v424_v45 = vmax.f32 %v416_v41, 0.0 }
  0xae   : > { %v421_v39 = vmax.f32 %v413_v38, 0.0 }
  0xaf   : > { %v393_v40 = vpop.f32.mrf.mxu2 }
  0xb0   : > { %v406_v42 = vmul.f32 %v786_v11, %v393_v40  ;;  %v427_v43 = vpack.c.bf16 %v421_v39, %v420_v36 }
  0xb2   : > { %v417_v44 = vadd.f32 %v787_v13, %v406_v42  ;;  %746 = vmatmul.msk.bf16.gmra.mxu1 %vm440_vm3, %v427_v43 }
  0xb4   : > { %v425_v46 = vmax.f32 %v417_v44, 0.0 }
  0xb6   : > { %v429_v47 = vpack.c.bf16 %v425_v46, %v424_v45 }
  0xb8   : > { %748 = vmatmul.msk.bf16.gmra.mxu3 %vm440_vm3, %v429_v47 }
 0x11f   : > { %v462_v48 = vpop.f32.mrf.mxu1 }
 0x120   : > { %v485_v50 = vmul.f32 %v788_v49, %v462_v48 }
 0x122   : > { %v496_v54 = vadd.f32 %v903_v51, %v485_v50 }
 0x124   : > { %v504_v59 = vmax.f32 %v496_v54, 0.0 }
 0x126   : > { %v513_v0 = vsel %vm512_vm4, %v504_v59, -inf }
 0x127   : > { %v464_v52 = vpop.f32.mrf.mxu1  ;;  %v514_v7 = vrot.slane %v513_v0, 4 }
 0x128   : > { %v486_v53 = vmul.f32 %v788_v49, %v464_v52 }
 0x129   : > { %v515_v16 = vmax.f32 %v513_v0, %v514_v7 }
 0x12a   : > { %v497_v55 = vadd.f32 %v903_v51, %v486_v53 }
 0x12b   : > { %v472_v56 = vpop.f32.mrf.mxu3  ;;  %v516_v26 = vrot.slane %v515_v16, 2 }
 0x12c   : > { %v505_v57 = vmax.f32 %v497_v55, 0.0  ;;  %v489_v58 = vmul.f32 %v788_v49, %v472_v56 }
 0x12d   : > { %v517_v35 = vmax.f32 %v515_v16, %v516_v26 }
 0x12e   : > { %v500_v60 = vadd.f32 %v903_v51, %v489_v58  ;;  %v520_v62 = vsel %vm512_vm4, %v505_v57, -inf }
 0x12f   : > { %v467_v61 = vpop.f32.mrf.mxu1  ;;  %v521_v2 = vrot.slane %v520_v62, 4  ;;  %v518_v46 = vrot.slane %v517_v35, 1 }
 0x130   : > { %v487_v63 = vmul.f32 %v788_v49, %v467_v61  ;;  %v508_v3 = vmax.f32 %v500_v60, 0.0 }
 0x131   : > { %v522_v10 = vmax.f32 %v520_v62, %v521_v2  ;;  %v519_v59 = vmax.f32 %v517_v35, %v518_v46 }
 0x132   : > { %v498_v1 = vadd.f32 %v903_v51, %v487_v63  ;;  %v541_v11 = vsel %vm512_vm4, %v508_v3, -inf }
 0x133   : > { %v474_v4 = vpop.f32.mrf.mxu3  ;;  %v542_v18 = vrot.slane %v541_v11, 4  ;;  %v523_v21 = vrot.slane %v522_v10, 2 }
 0x134   : > { %v506_v5 = vmax.f32 %v498_v1, 0.0  ;;  %v490_v6 = vmul.f32 %v788_v49, %v474_v4 }
 0x135   : > { %v543_v28 = vmax.f32 %v541_v11, %v542_v18  ;;  %v524_v31 = vmax.f32 %v522_v10, %v523_v21 }
 0x136   : > { %v527_v8 = vsel %vm512_vm4, %v506_v5, -inf  ;;  %v501_v9 = vadd.f32 %v903_v51, %v490_v6 }
 0x137   : > { %v528_v12 = vrot.slane %v527_v8, 4  ;;  %v469_v13 = vpop.f32.mrf.mxu1  ;;  %v544_v38 = vrot.slane %v543_v28, 2  ;;  %v525_v40 = vrot.slane %v524_v31, 1 }
 0x138   : > { %v509_v14 = vmax.f32 %v501_v9, 0.0  ;;  %v488_v15 = vmul.f32 %v788_v49, %v469_v13 }
 0x139   : > { %v529_v17 = vmax.f32 %v527_v8, %v528_v12  ;;  %v545_v52 = vmax.f32 %v543_v28, %v544_v38  ;;  %v526_v54 = vmax.f32 %v524_v31, %v525_v40 }
 0x13a   : > { %v548_v19 = vsel %vm512_vm4, %v509_v14, -inf  ;;  %v499_v20 = vadd.f32 %v903_v51, %v488_v15 }
 0x13b   : > { %v477_v22 = vpop.f32.mrf.mxu3  ;;  %v530_v23 = vrot.slane %v529_v17, 2  ;;  %v549_v27 = vrot.slane %v548_v19, 4  ;;  %v546_v62 = vrot.slane %v545_v52, 1  ;;  %v578_v1 = vsel %vm577_vm5, %v526_v54, %v519_v59 }
 0x13c   : > { %v507_v24 = vmax.f32 %v499_v20, 0.0  ;;  %v491_v25 = vmul.f32 %v788_v49, %v477_v22 }
 0x13d   : > { %v531_v33 = vmax.f32 %v529_v17, %v530_v23  ;;  %v550_v36 = vmax.f32 %v548_v19, %v549_v27  ;;  %v547_v5 = vmax.f32 %v545_v52, %v546_v62 }
 0x13e   : > { %v534_v29 = vsel %vm512_vm4, %v507_v24, -inf  ;;  %v502_v30 = vadd.f32 %v903_v51, %v491_v25 }
 0x13f   : > { %v535_v32 = vrot.slane %v534_v29, 4  ;;  %v532_v44 = vrot.slane %v531_v33, 1  ;;  %v551_v47 = vrot.slane %v550_v36, 2 }
 0x140   : > { %v510_v34 = vmax.f32 %v502_v30, 0.0 }
 0x141   : > { %v536_v37 = vmax.f32 %v534_v29, %v535_v32  ;;  %v533_v57 = vmax.f32 %v531_v33, %v532_v44  ;;  %v552_v60 = vmax.f32 %v550_v36, %v551_v47 }
 0x142   : > { %v555_v39 = vsel %vm512_vm4, %v510_v34, -inf }
 0x143   : > { %v537_v41 = vrot.slane %v536_v37, 2  ;;  %v556_v42 = vrot.slane %v555_v39, 4  ;;  %v479_v43 = vpop.f32.mrf.mxu3  ;;  %v580_v2 = vsel %vm579_vm6, %v533_v57, %v578_v1  ;;  %v553_v3 = vrot.slane %v552_v60, 1 }
 0x144   : > { %v492_v45 = vmul.f32 %v788_v49, %v479_v43 }
 0x145   : > { %v538_v48 = vmax.f32 %v536_v37, %v537_v41  ;;  %v557_v50 = vmax.f32 %v555_v39, %v556_v42  ;;  %v554_v9 = vmax.f32 %v552_v60, %v553_v3 }
 0x146   : > { %v503_v53 = vadd.f32 %v903_v51, %v492_v45 }
 0x147   : > { %v539_v55 = vrot.slane %v538_v48, 1  ;;  %v558_v56 = vrot.slane %v557_v50, 2 }
 0x148   : > { %v511_v58 = vmax.f32 %v503_v53, 0.0 }
 0x149   : > { %v540_v61 = vmax.f32 %v538_v48, %v539_v55  ;;  %v559_v63 = vmax.f32 %v557_v50, %v558_v56 }
 0x14a   : > { %v562_v49 = vsel %vm512_vm4, %v511_v58, -inf }
 0x14b   : > { %v563_v0 = vrot.slane %v562_v49, 4  ;;  %v582_v4 = vsel %vm581_vm7, %v540_v61, %v580_v2  ;;  %v560_v6 = vrot.slane %v559_v63, 1 }
 0x14c   : > { %v584_v8 = vsel %vm583_vm8, %v547_v5, %v582_v4 }
 0x14d   : > { %v564_v51 = vmax.f32 %v562_v49, %v563_v0  ;;  %v561_v11 = vmax.f32 %v559_v63, %v560_v6  ;;  %v586_v13 = vsel %vm585_vm9, %v554_v9, %v584_v8 }
 0x14f   : > { %v565_v7 = vrot.slane %v564_v51, 2  ;;  %v588_v15 = vsel %vm587_vm10, %v561_v11, %v586_v13 }
 0x151   : > { %v566_v10 = vmax.f32 %v564_v51, %v565_v7 }
 0x153   : > { %v567_v12 = vrot.slane %v566_v10, 1 }
 0x155   : > { %v568_v14 = vmax.f32 %v566_v10, %v567_v12 }
 0x157   : > { %v590_v16 = vsel %vm589_vm11, %v568_v14, %v588_v15 }
 0x158   : > { %592 = vxpose.xlu0.b32.start.end [1/1] (short) (narrow) %v590_v16, 32 }
 0x1fc   : > { %v608_v17 = vpop.trf.xlu0 }
 0x1fd   : > { %625 = vst.msk [vmem:[%s314_s23] sm:$0xff] %vm624_vm12, %v608_v17 }
 0x204   : > { %v609_v18 = vpop.trf.xlu0 }
 0x205   : > { %626 = vst.msk [vmem:[%s314_s23 + $0x8] sm:$0xff] %vm624_vm12, %v609_v18 }
 0x20c   : > { %v610_v19 = vpop.trf.xlu0 }
 0x20d   : > { %627 = vst.msk [vmem:[%s314_s23 + $0x10] sm:$0xff] %vm624_vm12, %v610_v19 }
 0x214   : > { %v611_v20 = vpop.trf.xlu0 }
 0x215   : > { %628 = vst.msk [vmem:[%s314_s23 + $0x18] sm:$0xff] %vm624_vm12, %v611_v20 }
 0x216 PF: > { %s17_s26 = sadd.s32 1, %s812_s26   ;;  %s943_s24 = smov %s808_s25 }
 0x217   : > { %p14_p5 = scmp.ge.s32.totalorder %s17_s26, 4   ;;  %s944_s25 = smov %s946_s27 }
 0x219   :  { %16 = sbr.rel (!%p14_p5) target bundleno = 2 (0x2), region = 78 }

</bundles_post_ra>
